<compile_context>
chip_gen: v7x
topology: tpu7x:2x2x1
jax: 0.10.0
libtpu: 0.0.40
codegen_flags: <defaults>
</compile_context>

<pallas_src>
import jax
import jax.numpy as jnp
from jax.experimental import pallas as pl
from jax.experimental.pallas import tpu as pltpu


def _round_up(x, m):
    return (x + m - 1) // m * m


def _make_kernel(G):
    def kernel(text_ref, bag_ref, *args):
        # args = (row_0 .. row_{G-1}, w_ref, b_ref, out_ref, acc_ref, cnt_ref)
        row_refs = args[:G]
        w_ref, b_ref, out_ref, acc_ref, cnt_ref = args[G:]

        step = pl.program_id(0)

        @pl.when(step == 0)
        def _():
            acc_ref[...] = jnp.zeros_like(acc_ref)
            cnt_ref[...] = jnp.zeros_like(cnt_ref)

        base = step * G
        ones_row = jnp.ones((1, cnt_ref.shape[-1]), jnp.float32)
        for k in range(G):                                   # static unroll over G gathered rows
            b = bag_ref[base + k]                            # this token's bag (padded -> trash row)
            acc_ref[b] = acc_ref[b] + row_refs[k][0]         # O(D) dynamic single-row accumulate
            cnt_ref[b] = cnt_ref[b] + ones_row               # in-kernel bag length count

        @pl.when(step == pl.num_programs(0) - 1)
        def _():
            acc = acc_ref[...][:, 0, :]                      # (B_acc, D) per-bag sums
            cnt = jnp.maximum(cnt_ref[...][:, 0, :], 1.0)    # empty bag -> divide by 1 (sum is 0)
            mean = acc / cnt                                 # exact mean, f32
            logits = jnp.dot(mean, w_ref[...],
                             preferred_element_type=jnp.float32) + b_ref[...]
            out_ref[...] = logits

    return kernel


def text_classification_forward(text, offsets, emb_table, cls_w, cls_b, *, tokens_per_step=8):
    """Replicates TextClassificationModel.forward(text, offsets) (EmbeddingBag mean + Linear)."""
    V, D = emb_table.shape
    C = cls_w.shape[0]
    T = int(text.shape[0])
    B = int(offsets.shape[0])

    C_pad = _round_up(C, 128)

    if T == 0:
        # No tokens: every bag is empty -> zero embedding -> logits are just the bias.
        return jnp.broadcast_to(cls_b.astype(jnp.float32), (B, C))

    G = tokens_per_step
    T_pad = _round_up(T, G)
    B_acc = _round_up(B + 1, 8)          # +1 trash row for padded / out-of-range tokens
    trash = B

    # token -> bag mapping (tiny 1-D glue, no dense B x V anywhere)
    tok = jnp.arange(T, dtype=jnp.int32)
    bag_id = (jnp.searchsorted(offsets.astype(jnp.int32), tok, side="right") - 1).astype(jnp.int32)
    bag_id = jnp.where(bag_id < 0, trash, bag_id)            # tokens before offsets[0] are dropped

    text_pad = jnp.zeros((T_pad,), jnp.int32).at[:T].set(text.astype(jnp.int32))
    bag_pad = jnp.full((T_pad,), trash, jnp.int32).at[:T].set(bag_id)

    # Embedding table stays in its stored dtype; (V,1,D) is a metadata-only view for row gather.
    emb_view = emb_table.reshape(V, 1, D)

    # Small classifier operands, lane-padded (zero columns -> exact logits after slicing).
    w_pad = jnp.zeros((D, C_pad), jnp.float32).at[:, :C].set(cls_w.T.astype(jnp.float32))
    bias_pad = jnp.zeros((1, C_pad), jnp.float32).at[0, :C].set(cls_b.astype(jnp.float32))

    def row_map(k):
        return lambda s, text_sm, bag_sm: (text_sm[s * G + k], 0, 0)

    in_specs = [pl.BlockSpec((1, 1, D), row_map(k)) for k in range(G)]
    in_specs += [
        pl.BlockSpec((D, C_pad), lambda s, text_sm, bag_sm: (0, 0)),
        pl.BlockSpec((1, C_pad), lambda s, text_sm, bag_sm: (0, 0)),
    ]

    grid_spec = pltpu.PrefetchScalarGridSpec(
        num_scalar_prefetch=2,                    # text, bag_id -> SMEM
        grid=(T_pad // G,),
        in_specs=in_specs,
        out_specs=pl.BlockSpec((B_acc, C_pad), lambda s, text_sm, bag_sm: (0, 0)),
        scratch_shapes=[
            pltpu.VMEM((B_acc, 1, D), jnp.float32),   # per-bag embedding sums
            pltpu.VMEM((B_acc, 1, D), jnp.float32),   # per-bag token counts
        ],
    )

    out = pl.pallas_call(
        _make_kernel(G),
        out_shape=jax.ShapeDtypeStruct((B_acc, C_pad), jnp.float32),
        grid_spec=grid_spec,
        compiler_params=pltpu.CompilerParams(
            dimension_semantics=("arbitrary",),       # token axis revisits the same output
        ),                                            # block (accumulator)
    )(text_pad, bag_pad, *([emb_view] * G), w_pad, bias_pad)

    return out[:B, :C]


if __name__ == "__main__":
    # Small deterministic problem consistent with the module's __init__.
    vocab_size = 50
    embed_dim = 32
    num_class = 4

    key = jax.random.PRNGKey(0)
    k_emb, k_w, k_txt = jax.random.split(key, 3)

    # init_weights(): uniform(-0.5, 0.5) for embedding & classifier weight, zero bias
    initrange = 0.5
    emb_table = jax.random.uniform(k_emb, (vocab_size, embed_dim),
                                   jnp.float32, -initrange, initrange)
    cls_w = jax.random.uniform(k_w, (num_class, embed_dim),
                               jnp.float32, -initrange, initrange)
    cls_b = jnp.zeros((num_class,), jnp.float32)

    # 20 tokens, 5 bags with lengths 3, 0 (empty bag), 4, 5, 8
    T = 20
    text = jax.random.randint(k_txt, (T,), 0, vocab_size, jnp.int32)
    offsets = jnp.array([0, 3, 3, 7, 12], jnp.int32)

    logits = text_classification_forward(text, offsets, emb_table, cls_w, cls_b)
    jax.block_until_ready(logits)

    # Reference: EmbeddingBag(mode='mean') + Linear in plain f32 JAX.
    tok_emb = emb_table[text]                                    # (T, D)
    B = offsets.shape[0]
    ends = [int(o) for o in offsets[1:]] + [T]
    rows = []
    for b in range(B):
        s, e = int(offsets[b]), int(ends[b])
        rows.append(tok_emb[s:e].mean(axis=0) if e > s
                    else jnp.zeros((embed_dim,), jnp.float32))   # empty bag -> zeros
    ref = jnp.stack(rows) @ cls_w.T + cls_b

    assert logits.shape == (B, num_class)
    # All-f32 math end to end -> tight tolerance.
    assert jnp.allclose(logits, ref, atol=1e-4, rtol=1e-4), (logits, ref)

    print("KERNEL_OK")
</pallas_src>

<mosaic_0001>
module attributes {stable_mosaic.version = 11 : i64} {
  func.func @kernel(%arg0: i32, %arg1: memref<24xi32, #tpu.memory_space<smem>>, %arg2: memref<24xi32, #tpu.memory_space<smem>>, %arg3: memref<1x1x32xf32, #tpu.memory_space<vmem>>, %arg4: memref<1x1x32xf32, #tpu.memory_space<vmem>>, %arg5: memref<1x1x32xf32, #tpu.memory_space<vmem>>, %arg6: memref<1x1x32xf32, #tpu.memory_space<vmem>>, %arg7: memref<1x1x32xf32, #tpu.memory_space<vmem>>, %arg8: memref<1x1x32xf32, #tpu.memory_space<vmem>>, %arg9: memref<1x1x32xf32, #tpu.memory_space<vmem>>, %arg10: memref<1x1x32xf32, #tpu.memory_space<vmem>>, %arg11: memref<32x128xf32, #tpu.memory_space<vmem>>, %arg12: memref<1x128xf32, #tpu.memory_space<vmem>>, %arg13: memref<8x128xf32, #tpu.memory_space<vmem>>, %arg14: memref<8x1x32xf32, #tpu.memory_space<vmem>>, %arg15: memref<8x1x32xf32, #tpu.memory_space<vmem>>) attributes {dimension_semantics = [#tpu.dimension_semantics<arbitrary>], iteration_bounds = array<i64: 3>, scalar_prefetch = 2 : i64, scratch_operands = 2 : i64, tpu.core_type = #tpu.core_type<tc>, window_params = [{transform_indices = @transform_0, window_bounds = array<i64: 1, 1, 32>}, {transform_indices = @transform_1, window_bounds = array<i64: 1, 1, 32>}, {transform_indices = @transform_2, window_bounds = array<i64: 1, 1, 32>}, {transform_indices = @transform_3, window_bounds = array<i64: 1, 1, 32>}, {transform_indices = @transform_4, window_bounds = array<i64: 1, 1, 32>}, {transform_indices = @transform_5, window_bounds = array<i64: 1, 1, 32>}, {transform_indices = @transform_6, window_bounds = array<i64: 1, 1, 32>}, {transform_indices = @transform_7, window_bounds = array<i64: 1, 1, 32>}, {pipeline_mode = #tpu.pipeline_mode<synchronous>, transform_indices = @transform_8, window_bounds = array<i64: 32, 128>}, {pipeline_mode = #tpu.pipeline_mode<synchronous>, transform_indices = @transform_9, window_bounds = array<i64: 1, 128>}, {pipeline_mode = #tpu.pipeline_mode<synchronous>, transform_indices = @transform_10, window_bounds = array<i64: 8, 128>}]} {
    %c0_i32 = arith.constant 0 : i32
    %0 = arith.cmpi eq, %arg0, %c0_i32 : i32
    %1 = arith.extui %0 : i1 to i32
    %c0_i32_0 = arith.constant 0 : i32
    %2 = arith.cmpi ne, %1, %c0_i32_0 : i32
    scf.if %2 {
      %cst_91 = arith.constant 0.000000e+00 : f32
      %176 = vector.broadcast %cst_91 : f32 to vector<8x1x32xf32>
      %c0_92 = arith.constant 0 : index
      %c0_93 = arith.constant 0 : index
      %c0_94 = arith.constant 0 : index
      %177 = vector.load %arg14[%c0_92, %c0_93, %c0_94] : memref<8x1x32xf32, #tpu.memory_space<vmem>>, vector<8x1x32xf32>
      tpu.vector_store %arg14[%c0_92, %c0_93, %c0_94], %176 {strides = array<i32>} : memref<8x1x32xf32, #tpu.memory_space<vmem>>, vector<8x1x32xf32>,
      %cst_95 = arith.constant 0.000000e+00 : f32
      %178 = vector.broadcast %cst_95 : f32 to vector<8x1x32xf32>
      %c0_96 = arith.constant 0 : index
      %c0_97 = arith.constant 0 : index
      %c0_98 = arith.constant 0 : index
      %179 = vector.load %arg15[%c0_96, %c0_97, %c0_98] : memref<8x1x32xf32, #tpu.memory_space<vmem>>, vector<8x1x32xf32>
      tpu.vector_store %arg15[%c0_96, %c0_97, %c0_98], %178 {strides = array<i32>} : memref<8x1x32xf32, #tpu.memory_space<vmem>>, vector<8x1x32xf32>,
    } else {
    }
    %c8_i32 = arith.constant 8 : i32
    %3 = arith.muli %arg0, %c8_i32 : i32
    %cst = arith.constant 1.000000e+00 : f32
    %4 = vector.broadcast %cst : f32 to vector<1x32xf32>
    %c0_i32_1 = arith.constant 0 : i32
    %5 = arith.addi %3, %c0_i32_1 : i32
    %6 = arith.index_cast %5 : i32 to index
    %7 = memref.load %arg2[%6] : memref<24xi32, #tpu.memory_space<smem>>
    %8 = arith.index_cast %7 : i32 to index
    %c0 = arith.constant 0 : index
    %c0_2 = arith.constant 0 : index
    %9 = vector.load %arg14[%8, %c0, %c0_2] : memref<8x1x32xf32, #tpu.memory_space<vmem>>, vector<1x1x32xf32>
    %10 = vector.shape_cast %9 : vector<1x1x32xf32> to vector<1x32xf32>
    %c0_3 = arith.constant 0 : index
    %c0_4 = arith.constant 0 : index
    %c0_5 = arith.constant 0 : index
    %11 = vector.load %arg3[%c0_3, %c0_4, %c0_5] : memref<1x1x32xf32, #tpu.memory_space<vmem>>, vector<1x1x32xf32>
    %12 = vector.shape_cast %11 : vector<1x1x32xf32> to vector<1x32xf32>
    %13 = arith.addf %10, %12 : vector<1x32xf32>
    %14 = arith.index_cast %7 : i32 to index
    %c0_6 = arith.constant 0 : index
    %c0_7 = arith.constant 0 : index
    %15 = vector.load %arg14[%14, %c0_6, %c0_7] : memref<8x1x32xf32, #tpu.memory_space<vmem>>, vector<1x1x32xf32>
    %16 = vector.shape_cast %15 : vector<1x1x32xf32> to vector<1x32xf32>
    %17 = vector.shape_cast %13 : vector<1x32xf32> to vector<1x1x32xf32>
    tpu.vector_store %arg14[%14, %c0_6, %c0_7], %17 {strides = array<i32>} : memref<8x1x32xf32, #tpu.memory_space<vmem>>, vector<1x1x32xf32>,
    %18 = arith.index_cast %7 : i32 to index
    %c0_8 = arith.constant 0 : index
    %c0_9 = arith.constant 0 : index
    %19 = vector.load %arg15[%18, %c0_8, %c0_9] : memref<8x1x32xf32, #tpu.memory_space<vmem>>, vector<1x1x32xf32>
    %20 = vector.shape_cast %19 : vector<1x1x32xf32> to vector<1x32xf32>
    %21 = arith.addf %20, %4 : vector<1x32xf32>
    %22 = arith.index_cast %7 : i32 to index
    %c0_10 = arith.constant 0 : index
    %c0_11 = arith.constant 0 : index
    %23 = vector.load %arg15[%22, %c0_10, %c0_11] : memref<8x1x32xf32, #tpu.memory_space<vmem>>, vector<1x1x32xf32>
    %24 = vector.shape_cast %23 : vector<1x1x32xf32> to vector<1x32xf32>
    %25 = vector.shape_cast %21 : vector<1x32xf32> to vector<1x1x32xf32>
    tpu.vector_store %arg15[%22, %c0_10, %c0_11], %25 {strides = array<i32>} : memref<8x1x32xf32, #tpu.memory_space<vmem>>, vector<1x1x32xf32>,
    %c1_i32 = arith.constant 1 : i32
    %26 = arith.addi %3, %c1_i32 : i32
    %27 = arith.index_cast %26 : i32 to index
    %28 = memref.load %arg2[%27] : memref<24xi32, #tpu.memory_space<smem>>
    %29 = arith.index_cast %28 : i32 to index
    %c0_12 = arith.constant 0 : index
    %c0_13 = arith.constant 0 : index
    %30 = vector.load %arg14[%29, %c0_12, %c0_13] : memref<8x1x32xf32, #tpu.memory_space<vmem>>, vector<1x1x32xf32>
    %31 = vector.shape_cast %30 : vector<1x1x32xf32> to vector<1x32xf32>
    %c0_14 = arith.constant 0 : index
    %c0_15 = arith.constant 0 : index
    %c0_16 = arith.constant 0 : index
    %32 = vector.load %arg4[%c0_14, %c0_15, %c0_16] : memref<1x1x32xf32, #tpu.memory_space<vmem>>, vector<1x1x32xf32>
    %33 = vector.shape_cast %32 : vector<1x1x32xf32> to vector<1x32xf32>
    %34 = arith.addf %31, %33 : vector<1x32xf32>
    %35 = arith.index_cast %28 : i32 to index
    %c0_17 = arith.constant 0 : index
    %c0_18 = arith.constant 0 : index
    %36 = vector.load %arg14[%35, %c0_17, %c0_18] : memref<8x1x32xf32, #tpu.memory_space<vmem>>, vector<1x1x32xf32>
    %37 = vector.shape_cast %36 : vector<1x1x32xf32> to vector<1x32xf32>
    %38 = vector.shape_cast %34 : vector<1x32xf32> to vector<1x1x32xf32>
    tpu.vector_store %arg14[%35, %c0_17, %c0_18], %38 {strides = array<i32>} : memref<8x1x32xf32, #tpu.memory_space<vmem>>, vector<1x1x32xf32>,
    %39 = arith.index_cast %28 : i32 to index
    %c0_19 = arith.constant 0 : index
    %c0_20 = arith.constant 0 : index
    %40 = vector.load %arg15[%39, %c0_19, %c0_20] : memref<8x1x32xf32, #tpu.memory_space<vmem>>, vector<1x1x32xf32>
    %41 = vector.shape_cast %40 : vector<1x1x32xf32> to vector<1x32xf32>
    %42 = arith.addf %41, %4 : vector<1x32xf32>
    %43 = arith.index_cast %28 : i32 to index
    %c0_21 = arith.constant 0 : index
    %c0_22 = arith.constant 0 : index
    %44 = vector.load %arg15[%43, %c0_21, %c0_22] : memref<8x1x32xf32, #tpu.memory_space<vmem>>, vector<1x1x32xf32>
    %45 = vector.shape_cast %44 : vector<1x1x32xf32> to vector<1x32xf32>
    %46 = vector.shape_cast %42 : vector<1x32xf32> to vector<1x1x32xf32>
    tpu.vector_store %arg15[%43, %c0_21, %c0_22], %46 {strides = array<i32>} : memref<8x1x32xf32, #tpu.memory_space<vmem>>, vector<1x1x32xf32>,
    %c2_i32 = arith.constant 2 : i32
    %47 = arith.addi %3, %c2_i32 : i32
    %48 = arith.index_cast %47 : i32 to index
    %49 = memref.load %arg2[%48] : memref<24xi32, #tpu.memory_space<smem>>
    %50 = arith.index_cast %49 : i32 to index
    %c0_23 = arith.constant 0 : index
    %c0_24 = arith.constant 0 : index
    %51 = vector.load %arg14[%50, %c0_23, %c0_24] : memref<8x1x32xf32, #tpu.memory_space<vmem>>, vector<1x1x32xf32>
    %52 = vector.shape_cast %51 : vector<1x1x32xf32> to vector<1x32xf32>
    %c0_25 = arith.constant 0 : index
    %c0_26 = arith.constant 0 : index
    %c0_27 = arith.constant 0 : index
    %53 = vector.load %arg5[%c0_25, %c0_26, %c0_27] : memref<1x1x32xf32, #tpu.memory_space<vmem>>, vector<1x1x32xf32>
    %54 = vector.shape_cast %53 : vector<1x1x32xf32> to vector<1x32xf32>
    %55 = arith.addf %52, %54 : vector<1x32xf32>
    %56 = arith.index_cast %49 : i32 to index
    %c0_28 = arith.constant 0 : index
    %c0_29 = arith.constant 0 : index
    %57 = vector.load %arg14[%56, %c0_28, %c0_29] : memref<8x1x32xf32, #tpu.memory_space<vmem>>, vector<1x1x32xf32>
    %58 = vector.shape_cast %57 : vector<1x1x32xf32> to vector<1x32xf32>
    %59 = vector.shape_cast %55 : vector<1x32xf32> to vector<1x1x32xf32>
    tpu.vector_store %arg14[%56, %c0_28, %c0_29], %59 {strides = array<i32>} : memref<8x1x32xf32, #tpu.memory_space<vmem>>, vector<1x1x32xf32>,
    %60 = arith.index_cast %49 : i32 to index
    %c0_30 = arith.constant 0 : index
    %c0_31 = arith.constant 0 : index
    %61 = vector.load %arg15[%60, %c0_30, %c0_31] : memref<8x1x32xf32, #tpu.memory_space<vmem>>, vector<1x1x32xf32>
    %62 = vector.shape_cast %61 : vector<1x1x32xf32> to vector<1x32xf32>
    %63 = arith.addf %62, %4 : vector<1x32xf32>
    %64 = arith.index_cast %49 : i32 to index
    %c0_32 = arith.constant 0 : index
    %c0_33 = arith.constant 0 : index
    %65 = vector.load %arg15[%64, %c0_32, %c0_33] : memref<8x1x32xf32, #tpu.memory_space<vmem>>, vector<1x1x32xf32>
    %66 = vector.shape_cast %65 : vector<1x1x32xf32> to vector<1x32xf32>
    %67 = vector.shape_cast %63 : vector<1x32xf32> to vector<1x1x32xf32>
    tpu.vector_store %arg15[%64, %c0_32, %c0_33], %67 {strides = array<i32>} : memref<8x1x32xf32, #tpu.memory_space<vmem>>, vector<1x1x32xf32>,
    %c3_i32 = arith.constant 3 : i32
    %68 = arith.addi %3, %c3_i32 : i32
    %69 = arith.index_cast %68 : i32 to index
    %70 = memref.load %arg2[%69] : memref<24xi32, #tpu.memory_space<smem>>
    %71 = arith.index_cast %70 : i32 to index
    %c0_34 = arith.constant 0 : index
    %c0_35 = arith.constant 0 : index
    %72 = vector.load %arg14[%71, %c0_34, %c0_35] : memref<8x1x32xf32, #tpu.memory_space<vmem>>, vector<1x1x32xf32>
    %73 = vector.shape_cast %72 : vector<1x1x32xf32> to vector<1x32xf32>
    %c0_36 = arith.constant 0 : index
    %c0_37 = arith.constant 0 : index
    %c0_38 = arith.constant 0 : index
    %74 = vector.load %arg6[%c0_36, %c0_37, %c0_38] : memref<1x1x32xf32, #tpu.memory_space<vmem>>, vector<1x1x32xf32>
    %75 = vector.shape_cast %74 : vector<1x1x32xf32> to vector<1x32xf32>
    %76 = arith.addf %73, %75 : vector<1x32xf32>
    %77 = arith.index_cast %70 : i32 to index
    %c0_39 = arith.constant 0 : index
    %c0_40 = arith.constant 0 : index
    %78 = vector.load %arg14[%77, %c0_39, %c0_40] : memref<8x1x32xf32, #tpu.memory_space<vmem>>, vector<1x1x32xf32>
    %79 = vector.shape_cast %78 : vector<1x1x32xf32> to vector<1x32xf32>
    %80 = vector.shape_cast %76 : vector<1x32xf32> to vector<1x1x32xf32>
    tpu.vector_store %arg14[%77, %c0_39, %c0_40], %80 {strides = array<i32>} : memref<8x1x32xf32, #tpu.memory_space<vmem>>, vector<1x1x32xf32>,
    %81 = arith.index_cast %70 : i32 to index
    %c0_41 = arith.constant 0 : index
    %c0_42 = arith.constant 0 : index
    %82 = vector.load %arg15[%81, %c0_41, %c0_42] : memref<8x1x32xf32, #tpu.memory_space<vmem>>, vector<1x1x32xf32>
    %83 = vector.shape_cast %82 : vector<1x1x32xf32> to vector<1x32xf32>
    %84 = arith.addf %83, %4 : vector<1x32xf32>
    %85 = arith.index_cast %70 : i32 to index
    %c0_43 = arith.constant 0 : index
    %c0_44 = arith.constant 0 : index
    %86 = vector.load %arg15[%85, %c0_43, %c0_44] : memref<8x1x32xf32, #tpu.memory_space<vmem>>, vector<1x1x32xf32>
    %87 = vector.shape_cast %86 : vector<1x1x32xf32> to vector<1x32xf32>
    %88 = vector.shape_cast %84 : vector<1x32xf32> to vector<1x1x32xf32>
    tpu.vector_store %arg15[%85, %c0_43, %c0_44], %88 {strides = array<i32>} : memref<8x1x32xf32, #tpu.memory_space<vmem>>, vector<1x1x32xf32>,
    %c4_i32 = arith.constant 4 : i32
    %89 = arith.addi %3, %c4_i32 : i32
    %90 = arith.index_cast %89 : i32 to index
    %91 = memref.load %arg2[%90] : memref<24xi32, #tpu.memory_space<smem>>
    %92 = arith.index_cast %91 : i32 to index
    %c0_45 = arith.constant 0 : index
    %c0_46 = arith.constant 0 : index
    %93 = vector.load %arg14[%92, %c0_45, %c0_46] : memref<8x1x32xf32, #tpu.memory_space<vmem>>, vector<1x1x32xf32>
    %94 = vector.shape_cast %93 : vector<1x1x32xf32> to vector<1x32xf32>
    %c0_47 = arith.constant 0 : index
    %c0_48 = arith.constant 0 : index
    %c0_49 = arith.constant 0 : index
    %95 = vector.load %arg7[%c0_47, %c0_48, %c0_49] : memref<1x1x32xf32, #tpu.memory_space<vmem>>, vector<1x1x32xf32>
    %96 = vector.shape_cast %95 : vector<1x1x32xf32> to vector<1x32xf32>
    %97 = arith.addf %94, %96 : vector<1x32xf32>
    %98 = arith.index_cast %91 : i32 to index
    %c0_50 = arith.constant 0 : index
    %c0_51 = arith.constant 0 : index
    %99 = vector.load %arg14[%98, %c0_50, %c0_51] : memref<8x1x32xf32, #tpu.memory_space<vmem>>, vector<1x1x32xf32>
    %100 = vector.shape_cast %99 : vector<1x1x32xf32> to vector<1x32xf32>
    %101 = vector.shape_cast %97 : vector<1x32xf32> to vector<1x1x32xf32>
    tpu.vector_store %arg14[%98, %c0_50, %c0_51], %101 {strides = array<i32>} : memref<8x1x32xf32, #tpu.memory_space<vmem>>, vector<1x1x32xf32>,
    %102 = arith.index_cast %91 : i32 to index
    %c0_52 = arith.constant 0 : index
    %c0_53 = arith.constant 0 : index
    %103 = vector.load %arg15[%102, %c0_52, %c0_53] : memref<8x1x32xf32, #tpu.memory_space<vmem>>, vector<1x1x32xf32>
    %104 = vector.shape_cast %103 : vector<1x1x32xf32> to vector<1x32xf32>
    %105 = arith.addf %104, %4 : vector<1x32xf32>
    %106 = arith.index_cast %91 : i32 to index
    %c0_54 = arith.constant 0 : index
    %c0_55 = arith.constant 0 : index
    %107 = vector.load %arg15[%106, %c0_54, %c0_55] : memref<8x1x32xf32, #tpu.memory_space<vmem>>, vector<1x1x32xf32>
    %108 = vector.shape_cast %107 : vector<1x1x32xf32> to vector<1x32xf32>
    %109 = vector.shape_cast %105 : vector<1x32xf32> to vector<1x1x32xf32>
    tpu.vector_store %arg15[%106, %c0_54, %c0_55], %109 {strides = array<i32>} : memref<8x1x32xf32, #tpu.memory_space<vmem>>, vector<1x1x32xf32>,
    %c5_i32 = arith.constant 5 : i32
    %110 = arith.addi %3, %c5_i32 : i32
    %111 = arith.index_cast %110 : i32 to index
    %112 = memref.load %arg2[%111] : memref<24xi32, #tpu.memory_space<smem>>
    %113 = arith.index_cast %112 : i32 to index
    %c0_56 = arith.constant 0 : index
    %c0_57 = arith.constant 0 : index
    %114 = vector.load %arg14[%113, %c0_56, %c0_57] : memref<8x1x32xf32, #tpu.memory_space<vmem>>, vector<1x1x32xf32>
    %115 = vector.shape_cast %114 : vector<1x1x32xf32> to vector<1x32xf32>
    %c0_58 = arith.constant 0 : index
    %c0_59 = arith.constant 0 : index
    %c0_60 = arith.constant 0 : index
    %116 = vector.load %arg8[%c0_58, %c0_59, %c0_60] : memref<1x1x32xf32, #tpu.memory_space<vmem>>, vector<1x1x32xf32>
    %117 = vector.shape_cast %116 : vector<1x1x32xf32> to vector<1x32xf32>
    %118 = arith.addf %115, %117 : vector<1x32xf32>
    %119 = arith.index_cast %112 : i32 to index
    %c0_61 = arith.constant 0 : index
    %c0_62 = arith.constant 0 : index
    %120 = vector.load %arg14[%119, %c0_61, %c0_62] : memref<8x1x32xf32, #tpu.memory_space<vmem>>, vector<1x1x32xf32>
    %121 = vector.shape_cast %120 : vector<1x1x32xf32> to vector<1x32xf32>
    %122 = vector.shape_cast %118 : vector<1x32xf32> to vector<1x1x32xf32>
    tpu.vector_store %arg14[%119, %c0_61, %c0_62], %122 {strides = array<i32>} : memref<8x1x32xf32, #tpu.memory_space<vmem>>, vector<1x1x32xf32>,
    %123 = arith.index_cast %112 : i32 to index
    %c0_63 = arith.constant 0 : index
    %c0_64 = arith.constant 0 : index
    %124 = vector.load %arg15[%123, %c0_63, %c0_64] : memref<8x1x32xf32, #tpu.memory_space<vmem>>, vector<1x1x32xf32>
    %125 = vector.shape_cast %124 : vector<1x1x32xf32> to vector<1x32xf32>
    %126 = arith.addf %125, %4 : vector<1x32xf32>
    %127 = arith.index_cast %112 : i32 to index
    %c0_65 = arith.constant 0 : index
    %c0_66 = arith.constant 0 : index
    %128 = vector.load %arg15[%127, %c0_65, %c0_66] : memref<8x1x32xf32, #tpu.memory_space<vmem>>, vector<1x1x32xf32>
    %129 = vector.shape_cast %128 : vector<1x1x32xf32> to vector<1x32xf32>
    %130 = vector.shape_cast %126 : vector<1x32xf32> to vector<1x1x32xf32>
    tpu.vector_store %arg15[%127, %c0_65, %c0_66], %130 {strides = array<i32>} : memref<8x1x32xf32, #tpu.memory_space<vmem>>, vector<1x1x32xf32>,
    %c6_i32 = arith.constant 6 : i32
    %131 = arith.addi %3, %c6_i32 : i32
    %132 = arith.index_cast %131 : i32 to index
    %133 = memref.load %arg2[%132] : memref<24xi32, #tpu.memory_space<smem>>
    %134 = arith.index_cast %133 : i32 to index
    %c0_67 = arith.constant 0 : index
    %c0_68 = arith.constant 0 : index
    %135 = vector.load %arg14[%134, %c0_67, %c0_68] : memref<8x1x32xf32, #tpu.memory_space<vmem>>, vector<1x1x32xf32>
    %136 = vector.shape_cast %135 : vector<1x1x32xf32> to vector<1x32xf32>
    %c0_69 = arith.constant 0 : index
    %c0_70 = arith.constant 0 : index
    %c0_71 = arith.constant 0 : index
    %137 = vector.load %arg9[%c0_69, %c0_70, %c0_71] : memref<1x1x32xf32, #tpu.memory_space<vmem>>, vector<1x1x32xf32>
    %138 = vector.shape_cast %137 : vector<1x1x32xf32> to vector<1x32xf32>
    %139 = arith.addf %136, %138 : vector<1x32xf32>
    %140 = arith.index_cast %133 : i32 to index
    %c0_72 = arith.constant 0 : index
    %c0_73 = arith.constant 0 : index
    %141 = vector.load %arg14[%140, %c0_72, %c0_73] : memref<8x1x32xf32, #tpu.memory_space<vmem>>, vector<1x1x32xf32>
    %142 = vector.shape_cast %141 : vector<1x1x32xf32> to vector<1x32xf32>
    %143 = vector.shape_cast %139 : vector<1x32xf32> to vector<1x1x32xf32>
    tpu.vector_store %arg14[%140, %c0_72, %c0_73], %143 {strides = array<i32>} : memref<8x1x32xf32, #tpu.memory_space<vmem>>, vector<1x1x32xf32>,
    %144 = arith.index_cast %133 : i32 to index
    %c0_74 = arith.constant 0 : index
    %c0_75 = arith.constant 0 : index
    %145 = vector.load %arg15[%144, %c0_74, %c0_75] : memref<8x1x32xf32, #tpu.memory_space<vmem>>, vector<1x1x32xf32>
    %146 = vector.shape_cast %145 : vector<1x1x32xf32> to vector<1x32xf32>
    %147 = arith.addf %146, %4 : vector<1x32xf32>
    %148 = arith.index_cast %133 : i32 to index
    %c0_76 = arith.constant 0 : index
    %c0_77 = arith.constant 0 : index
    %149 = vector.load %arg15[%148, %c0_76, %c0_77] : memref<8x1x32xf32, #tpu.memory_space<vmem>>, vector<1x1x32xf32>
    %150 = vector.shape_cast %149 : vector<1x1x32xf32> to vector<1x32xf32>
    %151 = vector.shape_cast %147 : vector<1x32xf32> to vector<1x1x32xf32>
    tpu.vector_store %arg15[%148, %c0_76, %c0_77], %151 {strides = array<i32>} : memref<8x1x32xf32, #tpu.memory_space<vmem>>, vector<1x1x32xf32>,
    %c7_i32 = arith.constant 7 : i32
    %152 = arith.addi %3, %c7_i32 : i32
    %153 = arith.index_cast %152 : i32 to index
    %154 = memref.load %arg2[%153] : memref<24xi32, #tpu.memory_space<smem>>
    %155 = arith.index_cast %154 : i32 to index
    %c0_78 = arith.constant 0 : index
    %c0_79 = arith.constant 0 : index
    %156 = vector.load %arg14[%155, %c0_78, %c0_79] : memref<8x1x32xf32, #tpu.memory_space<vmem>>, vector<1x1x32xf32>
    %157 = vector.shape_cast %156 : vector<1x1x32xf32> to vector<1x32xf32>
    %c0_80 = arith.constant 0 : index
    %c0_81 = arith.constant 0 : index
    %c0_82 = arith.constant 0 : index
    %158 = vector.load %arg10[%c0_80, %c0_81, %c0_82] : memref<1x1x32xf32, #tpu.memory_space<vmem>>, vector<1x1x32xf32>
    %159 = vector.shape_cast %158 : vector<1x1x32xf32> to vector<1x32xf32>
    %160 = arith.addf %157, %159 : vector<1x32xf32>
    %161 = arith.index_cast %154 : i32 to index
    %c0_83 = arith.constant 0 : index
    %c0_84 = arith.constant 0 : index
    %162 = vector.load %arg14[%161, %c0_83, %c0_84] : memref<8x1x32xf32, #tpu.memory_space<vmem>>, vector<1x1x32xf32>
    %163 = vector.shape_cast %162 : vector<1x1x32xf32> to vector<1x32xf32>
    %164 = vector.shape_cast %160 : vector<1x32xf32> to vector<1x1x32xf32>
    tpu.vector_store %arg14[%161, %c0_83, %c0_84], %164 {strides = array<i32>} : memref<8x1x32xf32, #tpu.memory_space<vmem>>, vector<1x1x32xf32>,
    %165 = arith.index_cast %154 : i32 to index
    %c0_85 = arith.constant 0 : index
    %c0_86 = arith.constant 0 : index
    %166 = vector.load %arg15[%165, %c0_85, %c0_86] : memref<8x1x32xf32, #tpu.memory_space<vmem>>, vector<1x1x32xf32>
    %167 = vector.shape_cast %166 : vector<1x1x32xf32> to vector<1x32xf32>
    %168 = arith.addf %167, %4 : vector<1x32xf32>
    %169 = arith.index_cast %154 : i32 to index
    %c0_87 = arith.constant 0 : index
    %c0_88 = arith.constant 0 : index
    %170 = vector.load %arg15[%169, %c0_87, %c0_88] : memref<8x1x32xf32, #tpu.memory_space<vmem>>, vector<1x1x32xf32>
    %171 = vector.shape_cast %170 : vector<1x1x32xf32> to vector<1x32xf32>
    %172 = vector.shape_cast %168 : vector<1x32xf32> to vector<1x1x32xf32>
    tpu.vector_store %arg15[%169, %c0_87, %c0_88], %172 {strides = array<i32>} : memref<8x1x32xf32, #tpu.memory_space<vmem>>, vector<1x1x32xf32>,
    %c2_i32_89 = arith.constant 2 : i32
    %173 = arith.cmpi eq, %arg0, %c2_i32_89 : i32
    %174 = arith.extui %173 : i1 to i32
    %c0_i32_90 = arith.constant 0 : i32
    %175 = arith.cmpi ne, %174, %c0_i32_90 : i32
    scf.if %175 {
      %c0_91 = arith.constant 0 : index
      %c0_92 = arith.constant 0 : index
      %c0_93 = arith.constant 0 : index
      %176 = vector.load %arg14[%c0_91, %c0_92, %c0_93] : memref<8x1x32xf32, #tpu.memory_space<vmem>>, vector<8x1x32xf32>
      %177 = vector.shape_cast %176 : vector<8x1x32xf32> to vector<8x32xf32>
      %c0_94 = arith.constant 0 : index
      %c0_95 = arith.constant 0 : index
      %c0_96 = arith.constant 0 : index
      %178 = vector.load %arg15[%c0_94, %c0_95, %c0_96] : memref<8x1x32xf32, #tpu.memory_space<vmem>>, vector<8x1x32xf32>
      %179 = vector.shape_cast %178 : vector<8x1x32xf32> to vector<8x32xf32>
      %cst_97 = arith.constant 1.000000e+00 : f32
      %180 = vector.broadcast %cst_97 : f32 to vector<8x32xf32>
      %181 = arith.maximumf %179, %180 : vector<8x32xf32>
      %182 = arith.divf %177, %181 : vector<8x32xf32>
      %c0_98 = arith.constant 0 : index
      %c0_99 = arith.constant 0 : index
      %183 = vector.load %arg11[%c0_98, %c0_99] : memref<32x128xf32, #tpu.memory_space<vmem>>, vector<32x128xf32>
      %cst_100 = arith.constant dense<0.000000e+00> : vector<8x128xf32>
      %184 = tpu.matmul %182, %183, %cst_100 {dimension_numbers = #tpu.dot_dimension_numbers<[1], [0], [0], [1], [0, 0, 1, 1], [], []>} : vector<8x32xf32>, vector<32x128xf32>, vector<8x128xf32> -> vector<8x128xf32>
      %c0_101 = arith.constant 0 : index
      %c0_102 = arith.constant 0 : index
      %185 = vector.load %arg12[%c0_101, %c0_102] : memref<1x128xf32, #tpu.memory_space<vmem>>, vector<1x128xf32>
      %186 = vector.broadcast %185 : vector<1x128xf32> to vector<8x128xf32>
      %187 = arith.addf %184, %186 : vector<8x128xf32>
      %c0_103 = arith.constant 0 : index
      %c0_104 = arith.constant 0 : index
      %188 = vector.load %arg13[%c0_103, %c0_104] : memref<8x128xf32, #tpu.memory_space<vmem>>, vector<8x128xf32>
      tpu.vector_store %arg13[%c0_103, %c0_104], %187 {strides = array<i32>} : memref<8x128xf32, #tpu.memory_space<vmem>>, vector<8x128xf32>,
    } else {
    }
    return
  }
  func.func @transform_0(%arg0: i32, %arg1: memref<24xi32, #tpu.memory_space<smem>>, %arg2: memref<24xi32, #tpu.memory_space<smem>>) -> (i32, i32, i32) {
    %c8_i32 = arith.constant 8 : i32
    %0 = arith.muli %arg0, %c8_i32 : i32
    %c0_i32 = arith.constant 0 : i32
    %1 = arith.addi %0, %c0_i32 : i32
    %2 = arith.index_cast %1 : i32 to index
    %3 = memref.load %arg1[%2] : memref<24xi32, #tpu.memory_space<smem>>
    %c0_i32_0 = arith.constant 0 : i32
    %c0_i32_1 = arith.constant 0 : i32
    %c0_i32_2 = arith.constant 0 : i32
    return %3, %c0_i32_0, %c0_i32_1 : i32, i32, i32
  }
  func.func @transform_1(%arg0: i32, %arg1: memref<24xi32, #tpu.memory_space<smem>>, %arg2: memref<24xi32, #tpu.memory_space<smem>>) -> (i32, i32, i32) {
    %c8_i32 = arith.constant 8 : i32
    %0 = arith.muli %arg0, %c8_i32 : i32
    %c1_i32 = arith.constant 1 : i32
    %1 = arith.addi %0, %c1_i32 : i32
    %2 = arith.index_cast %1 : i32 to index
    %3 = memref.load %arg1[%2] : memref<24xi32, #tpu.memory_space<smem>>
    %c0_i32 = arith.constant 0 : i32
    %c0_i32_0 = arith.constant 0 : i32
    %c0_i32_1 = arith.constant 0 : i32
    return %3, %c0_i32, %c0_i32_0 : i32, i32, i32
  }
  func.func @transform_2(%arg0: i32, %arg1: memref<24xi32, #tpu.memory_space<smem>>, %arg2: memref<24xi32, #tpu.memory_space<smem>>) -> (i32, i32, i32) {
    %c8_i32 = arith.constant 8 : i32
    %0 = arith.muli %arg0, %c8_i32 : i32
    %c2_i32 = arith.constant 2 : i32
    %1 = arith.addi %0, %c2_i32 : i32
    %2 = arith.index_cast %1 : i32 to index
    %3 = memref.load %arg1[%2] : memref<24xi32, #tpu.memory_space<smem>>
    %c0_i32 = arith.constant 0 : i32
    %c0_i32_0 = arith.constant 0 : i32
    %c0_i32_1 = arith.constant 0 : i32
    return %3, %c0_i32, %c0_i32_0 : i32, i32, i32
  }
  func.func @transform_3(%arg0: i32, %arg1: memref<24xi32, #tpu.memory_space<smem>>, %arg2: memref<24xi32, #tpu.memory_space<smem>>) -> (i32, i32, i32) {
    %c8_i32 = arith.constant 8 : i32
    %0 = arith.muli %arg0, %c8_i32 : i32
    %c3_i32 = arith.constant 3 : i32
    %1 = arith.addi %0, %c3_i32 : i32
    %2 = arith.index_cast %1 : i32 to index
    %3 = memref.load %arg1[%2] : memref<24xi32, #tpu.memory_space<smem>>
    %c0_i32 = arith.constant 0 : i32
    %c0_i32_0 = arith.constant 0 : i32
    %c0_i32_1 = arith.constant 0 : i32
    return %3, %c0_i32, %c0_i32_0 : i32, i32, i32
  }
  func.func @transform_4(%arg0: i32, %arg1: memref<24xi32, #tpu.memory_space<smem>>, %arg2: memref<24xi32, #tpu.memory_space<smem>>) -> (i32, i32, i32) {
    %c8_i32 = arith.constant 8 : i32
    %0 = arith.muli %arg0, %c8_i32 : i32
    %c4_i32 = arith.constant 4 : i32
    %1 = arith.addi %0, %c4_i32 : i32
    %2 = arith.index_cast %1 : i32 to index
    %3 = memref.load %arg1[%2] : memref<24xi32, #tpu.memory_space<smem>>
    %c0_i32 = arith.constant 0 : i32
    %c0_i32_0 = arith.constant 0 : i32
    %c0_i32_1 = arith.constant 0 : i32
    return %3, %c0_i32, %c0_i32_0 : i32, i32, i32
  }
  func.func @transform_5(%arg0: i32, %arg1: memref<24xi32, #tpu.memory_space<smem>>, %arg2: memref<24xi32, #tpu.memory_space<smem>>) -> (i32, i32, i32) {
    %c8_i32 = arith.constant 8 : i32
    %0 = arith.muli %arg0, %c8_i32 : i32
    %c5_i32 = arith.constant 5 : i32
    %1 = arith.addi %0, %c5_i32 : i32
    %2 = arith.index_cast %1 : i32 to index
    %3 = memref.load %arg1[%2] : memref<24xi32, #tpu.memory_space<smem>>
    %c0_i32 = arith.constant 0 : i32
    %c0_i32_0 = arith.constant 0 : i32
    %c0_i32_1 = arith.constant 0 : i32
    return %3, %c0_i32, %c0_i32_0 : i32, i32, i32
  }
  func.func @transform_6(%arg0: i32, %arg1: memref<24xi32, #tpu.memory_space<smem>>, %arg2: memref<24xi32, #tpu.memory_space<smem>>) -> (i32, i32, i32) {
    %c8_i32 = arith.constant 8 : i32
    %0 = arith.muli %arg0, %c8_i32 : i32
    %c6_i32 = arith.constant 6 : i32
    %1 = arith.addi %0, %c6_i32 : i32
    %2 = arith.index_cast %1 : i32 to index
    %3 = memref.load %arg1[%2] : memref<24xi32, #tpu.memory_space<smem>>
    %c0_i32 = arith.constant 0 : i32
    %c0_i32_0 = arith.constant 0 : i32
    %c0_i32_1 = arith.constant 0 : i32
    return %3, %c0_i32, %c0_i32_0 : i32, i32, i32
  }
  func.func @transform_7(%arg0: i32, %arg1: memref<24xi32, #tpu.memory_space<smem>>, %arg2: memref<24xi32, #tpu.memory_space<smem>>) -> (i32, i32, i32) {
    %c8_i32 = arith.constant 8 : i32
    %0 = arith.muli %arg0, %c8_i32 : i32
    %c7_i32 = arith.constant 7 : i32
    %1 = arith.addi %0, %c7_i32 : i32
    %2 = arith.index_cast %1 : i32 to index
    %3 = memref.load %arg1[%2] : memref<24xi32, #tpu.memory_space<smem>>
    %c0_i32 = arith.constant 0 : i32
    %c0_i32_0 = arith.constant 0 : i32
    %c0_i32_1 = arith.constant 0 : i32
    return %3, %c0_i32, %c0_i32_0 : i32, i32, i32
  }
  func.func @transform_8(%arg0: i32, %arg1: memref<24xi32, #tpu.memory_space<smem>>, %arg2: memref<24xi32, #tpu.memory_space<smem>>) -> (i32, i32) {
    %c0_i32 = arith.constant 0 : i32
    %c0_i32_0 = arith.constant 0 : i32
    %c0_i32_1 = arith.constant 0 : i32
    return %c0_i32, %c0_i32_0 : i32, i32
  }
  func.func @transform_9(%arg0: i32, %arg1: memref<24xi32, #tpu.memory_space<smem>>, %arg2: memref<24xi32, #tpu.memory_space<smem>>) -> (i32, i32) {
    %c0_i32 = arith.constant 0 : i32
    %c0_i32_0 = arith.constant 0 : i32
    %c0_i32_1 = arith.constant 0 : i32
    return %c0_i32, %c0_i32_0 : i32, i32
  }
  func.func @transform_10(%arg0: i32, %arg1: memref<24xi32, #tpu.memory_space<smem>>, %arg2: memref<24xi32, #tpu.memory_space<smem>>) -> (i32, i32) {
    %c0_i32 = arith.constant 0 : i32
    %c0_i32_0 = arith.constant 0 : i32
    %c0_i32_1 = arith.constant 0 : i32
    return %c0_i32, %c0_i32_0 : i32, i32
  }
}

</mosaic_0001>

<bundles_post_ra>
// kernel: tpu_custom_call.1
= control target key start
LH: loop header
LB: loop body
LE: loop exit
PB: predicated region body
PF: predicated region fallthrough
CT: control target
= control target key end

     0   :  { %s1498_s0 = inlined_call_operand.vmem [shape: s32[24], index: 0, kind: input, shape index: {}]   ;;  %s1499_s2 = inlined_call_operand.vmem [shape: f32[50,1,32], index: 2, kind: input, shape index: {}]   ;;  %s1500_s3 = inlined_call_operand.vmem [shape: f32[50,1,32], index: 3, kind: input, shape index: {}]   ;;  %s1501_s4 = inlined_call_operand.vmem [shape: f32[50,1,32], index: 4, kind: input, shape index: {}]   ;;  %s1502_s5 = inlined_call_operand.vmem [shape: f32[50,1,32], index: 5, kind: input, shape index: {}]   ;;  %s1503_s6 = inlined_call_operand.vmem [shape: f32[50,1,32], index: 6, kind: input, shape index: {}]   ;;  %s1504_s7 = inlined_call_operand.vmem [shape: f32[50,1,32], index: 7, kind: input, shape index: {}]   ;;  %s1505_s8 = inlined_call_operand.vmem [shape: f32[50,1,32], index: 8, kind: input, shape index: {}]   ;;  %s1506_s9 = inlined_call_operand.vmem [shape: f32[50,1,32], index: 9, kind: input, shape index: {}]   ;;  %s1507_s10 = inlined_call_operand.vmem [shape: f32[32,128], index: 10, kind: input, shape index: {}]   ;;  %s1508_s11 = inlined_call_operand.vmem [shape: f32[1,128], index: 11, kind: input, shape index: {}]   ;;  %s1509_s12 = inlined_call_operand.hbm [shape: f32[8,128], index: 12, kind: output, shape index: {}]   ;;  %s1510_s1 = inlined_call_operand.vmem [shape: s32[24], index: 1, kind: input, shape index: {}]  }
   0x1   :  { %s17_s23 = sshll.u32 %s1498_s0, 4  ;;  %s21_s26 = sshll.u32 %s1510_s1, 4  ;;  %s18_s23 = int_to_ptr.vmem [resolvable:$true] %s17_s23  ;;  %s22_s26 = int_to_ptr.vmem [resolvable:$true] %s21_s26 }
   0x2   :  { %s1142_s27 = scalar_lea.vmem %s18_s23, 16  ;;  %p1147_p1 = scmp.lt.s32.totalorder %s18_s23, %s18_s23 }
   0x3   :  { %p1143_p0 = scmp.ne.s32.totalorder %s18_s23, %s1142_s27  ;;  %p1148_p2 = scmp.lt.s32.totalorder %s1142_s27, %s1142_s27 }
   0x5   :  { %p1149_p3 = por %p1148_p2, %p1147_p1 }
   0x7   :  { %p1150_p4 = pnand %p1149_p3, %p1143_p0 }
   0x9   :  { %1153 = shalt.err (!%p1150_p4)  }
   0xa   :  { %s1206_s28 = smov [#allocation5]   ;;  %s1154_s29 = scalar_lea.vmem %s22_s26, 16 }
   0xb   :  { %20 = dma.vmem_to_smem %s18_s23, 16, %s1206_s28, [#allocation4] }
   0xc   :  { %p1155_p5 = scmp.ne.s32.totalorder %s22_s26, %s1154_s29  ;;  %p1159_p6 = scmp.lt.s32.totalorder %s22_s26, %s22_s26 }
   0xd   :  { %p1160_p7 = scmp.lt.s32.totalorder %s1154_s29, %s1154_s29 }
   0xf   :  { %p1161_p8 = por %p1160_p7, %p1159_p6 }
  0x11   :  { %p1162_p9 = pnand %p1161_p8, %p1155_p5 }
  0x13   :  { %1165 = shalt.err (!%p1162_p9)  }
  0x14   :  { %s1207_s0 = smov [#allocation6]  }
  0x15   :  { %24 = dma.vmem_to_smem %s22_s26, 16, %s1207_s0, [#allocation4] }
  0x16   :  { %1196 = dma.done.wait [#allocation4], 32 }
  0x17   :  { %1197 = vsyncadd [#allocation4], 4294967264 }
  0x18   :  { %26 = sfence }
  0x19   :  { %27 = vsyncpa [#allocation8], 0  ;;  %s1285_s1 = smov 0  }
  0x1a LB: > { %1519 = sst [smem:[#allocation11_spill]] %s1204_s1  ;;  %s1291_s30 = sadd.s32 4294967295, %s1204_s1   ;;  %s1204_s1 = sphi %s1285_s1, %s33_s1  }
  0x1b   : > { %p1048_p10 = scmp.ge.s32.totalorder %s1204_s1, 1  ;;  %p466_p11 = scmp.lt.s32.totalorder %s1204_s1, 4 }
  0x1d   : > { %p467_p12 = pnand %p1048_p10, %p466_p11 }
  0x1e   : > { %s1296_s13 = sshll.u32 (!%p467_p12), %s1291_s30, 3  ;;  %p1057_p7 = scmp.ne.s32.totalorder (!%p467_p12), %s1291_s30, 0 }
  0x1f   : > { %470 = sbr.rel (%p467_p12) target bundleno = 414 (0x19e), region = 60  ;;  %s542_s14 = sld [smem:[#allocation5 + %s1296_s13]] (!%p467_p12) }
  0x20   : > { %s1516_s15 = sadd.s32 (!%p467_p12), 1, %s1296_s13  ;;  %s1515_s17 = sadd.s32 (!%p467_p12), 2, %s1296_s13 }
  0x21   : > { %s550_s16 = sld [smem:[#allocation5 + %s1516_s15]] (!%p467_p12)  ;;  %s1513_s19 = sadd.s32 (!%p467_p12), 3, %s1296_s13 }
  0x22   : > { %s559_s18 = sld [smem:[#allocation5 + %s1515_s17]] (!%p467_p12)  ;;  %s1511_s21 = sadd.s32 (!%p467_p12), 4, %s1296_s13 }
  0x23   : > { %s568_s20 = sld [smem:[#allocation5 + %s1513_s19]] (!%p467_p12)  ;;  %s1512_s23 = sadd.s32 (!%p467_p12), 5, %s1296_s13 }
  0x24   : > { %s577_s22 = sld [smem:[#allocation5 + %s1511_s21]] (!%p467_p12)  ;;  %s1514_s25 = sadd.s32 (!%p467_p12), 6, %s1296_s13 }
  0x25   : > { %s586_s24 = sld [smem:[#allocation5 + %s1512_s23]] (!%p467_p12)  ;;  %p543_p13 = scmp.lt.s32.totalorder (!%p467_p12), %s542_s14, 49 }
  0x26   : > { %s595_s26 = sld [smem:[#allocation5 + %s1514_s25]]  ;;  %s1518_s27 = sadd.s32 7, %s1296_s13  ;;  %vm615_vm0 = vcmask (!%p1057_p7), 253952   ;;  %v1208_v0 = vmov (!%p1057_p7), 0.0  }
  0x27   : > { %p551_p0 = scmp.lt.s32.totalorder %s550_s16, 49  ;;  %s1537_s14 = smov (!%p543_p13, %s542_s14), 49  ;;  %616 = vst.msk [vmem:[#allocation2] sm:$0x1] (!%p1057_p7), %vm615_vm0, %v1208_v0  ;;  %617 = vst.msk [vmem:[#allocation2 + $0x1] sm:$0x1] (!%p1057_p7), %vm615_vm0, %v1208_v0 }
  0x28   : > { %p560_p1 = scmp.lt.s32.totalorder %s559_s18, 49  ;;  %s604_s1 = sld [smem:[#allocation5 + %s1518_s27]]  ;;  %618 = vst.msk [vmem:[#allocation2 + $0x2] sm:$0x1] (!%p1057_p7), %vm615_vm0, %v1208_v0  ;;  %619 = vst.msk [vmem:[#allocation2 + $0x3] sm:$0x1] (!%p1057_p7), %vm615_vm0, %v1208_v0 }
  0x29   : > { %s1539_s16 = smov (!%p551_p0, %s550_s16), 49  ;;  %p569_p2 = scmp.lt.s32.totalorder %s568_s20, 49  ;;  %620 = vst.msk [vmem:[#allocation2 + $0x4] sm:$0x1] (!%p1057_p7), %vm615_vm0, %v1208_v0  ;;  %621 = vst.msk [vmem:[#allocation2 + $0x5] sm:$0x1] (!%p1057_p7), %vm615_vm0, %v1208_v0 }
  0x2a   : > { %s1541_s18 = smov (!%p560_p1, %s559_s18), 49  ;;  %p578_p3 = scmp.lt.s32.totalorder %s577_s22, 49  ;;  %622 = vst.msk [vmem:[#allocation2 + $0x6] sm:$0x1] (!%p1057_p7), %vm615_vm0, %v1208_v0  ;;  %623 = vst.msk [vmem:[#allocation2 + $0x7] sm:$0x1] (!%p1057_p7), %vm615_vm0, %v1208_v0 }
  0x2b   : > { %s1543_s20 = smov (!%p569_p2, %s568_s20), 49  ;;  %p587_p4 = scmp.lt.s32.totalorder %s586_s24, 49  ;;  %624 = vst.msk [vmem:[#allocation3] sm:$0x1] (!%p1057_p7), %vm615_vm0, %v1208_v0  ;;  %625 = vst.msk [vmem:[#allocation3 + $0x1] sm:$0x1] (!%p1057_p7), %vm615_vm0, %v1208_v0 }
  0x2c   : > { %s1545_s22 = smov (!%p578_p3, %s577_s22), 49  ;;  %p596_p5 = scmp.lt.s32.totalorder %s595_s26, 49  ;;  %626 = vst.msk [vmem:[#allocation3 + $0x2] sm:$0x1] (!%p1057_p7), %vm615_vm0, %v1208_v0  ;;  %627 = vst.msk [vmem:[#allocation3 + $0x3] sm:$0x1] (!%p1057_p7), %vm615_vm0, %v1208_v0 }
  0x2d   : > { %s1547_s24 = smov (!%p587_p4, %s586_s24), 49  ;;  %614 = sbr.rel (%p1057_p7) target bundleno = 52 (0x34), region = 64 }
  0x2e   : > { %s1549_s26 = smov (!%p596_p5, %s595_s26), 49  ;;  %p605_p6 = scmp.lt.s32.totalorder %s604_s1, 49  ;;  %628 = vst.msk [vmem:[#allocation3 + $0x4] sm:$0x1] (!%p1057_p7), %vm615_vm0, %v1208_v0  ;;  %629 = vst.msk [vmem:[#allocation3 + $0x5] sm:$0x1] (!%p1057_p7), %vm615_vm0, %v1208_v0 }
  0x2f   : > { %630 = vst.msk [vmem:[#allocation3 + $0x6] sm:$0x1] (!%p1057_p7), %vm615_vm0, %v1208_v0  ;;  %631 = vst.msk [vmem:[#allocation3 + $0x7] sm:$0x1] (!%p1057_p7), %vm615_vm0, %v1208_v0 }
  0x30   : > { %s1551_s1 = smov (!%p605_p6, %s604_s1), 49 }
  0x34 PF: > { %s633_s17 = sld [smem:[#allocation6 + %s1296_s13]]  ;;  %s1520_s29 = scalar_lea.vmem %s1499_s2, %s1537_s14  ;;  %vm638_vm1 = vcmask 253952  }
  0x35   : > { %v636_v1 = vld [vmem:[%s1520_s29] sm:$0x1]  ;;  %s1521_s21 = sadd.s32 1, %s1296_s13  ;;  %s1522_s14 = scalar_lea.vmem %s1500_s3, %s1539_s16 }
  0x36   : > { %s645_s23 = sld [smem:[#allocation6 + %s1521_s21]]  ;;  %v648_v6 = vld [vmem:[%s1522_s14] sm:$0x1]  ;;  %s1523_s25 = sadd.s32 2, %s1296_s13 }
  0x37   : > { %s656_s28 = sld [smem:[#allocation6 + %s1523_s25]]  ;;  %s1524_s15 = scalar_lea.vmem %s1501_s4, %s1541_s18 }
  0x38   : > { %v659_v11 = vld [vmem:[%s1524_s15] sm:$0x1]  ;;  %s1525_s16 = sadd.s32 3, %s1296_s13  ;;  %s1527_s18 = sadd.s32 4, %s1296_s13 }
  0x39   : > { %s667_s0 = sld [smem:[#allocation6 + %s1525_s16]]  ;;  %s1528_s16 = scalar_lea.vmem %s1503_s6, %s1545_s22 }
  0x3a   : > { %s634_s19 = scalar_lea.vmem [#allocation2], %s633_s17  ;;  %s640_s27 = scalar_lea.vmem [#allocation3], %s633_s17  ;;  %v681_v21 = vld [vmem:[%s1528_s16] sm:$0x1] }
  0x3b   : > { %v635_v2 = vld [vmem:[%s634_s19] sm:$0x1]  ;;  %s1531_s22 = sadd.s32 6, %s1296_s13  ;;  %s1532_s15 = scalar_lea.vmem %s1505_s8, %s1549_s26 }
  0x3c   : > { %v641_v3 = vld [vmem:[%s640_s27] sm:$0x1]  ;;  %v637_v4 = vadd.f32 %v636_v1, %v635_v2  ;;  %s646_s29 = scalar_lea.vmem [#allocation2], %s645_s23  ;;  %s651_s21 = scalar_lea.vmem [#allocation3], %s645_s23 }
  0x3d   : > { %v642_v5 = vadd.f32 1.0, %v641_v3  ;;  %s657_s17 = scalar_lea.vmem [#allocation2], %s656_s28  ;;  %s662_s14 = scalar_lea.vmem [#allocation3], %s656_s28  ;;  %v703_v31 = vld [vmem:[%s1532_s15] sm:$0x1] }
  0x3e   : > { %639 = vst.msk [vmem:[%s634_s19] sm:$0x1] %vm638_vm1, %v637_v4  ;;  %p1059_p8 = scmp.ne.s32.totalorder %s1291_s30, 2 }
  0x3f   : > { %643 = vst.msk [vmem:[%s640_s27] sm:$0x1] %vm638_vm1, %v642_v5  ;;  %s668_s19 = scalar_lea.vmem [#allocation2], %s667_s0  ;;  %s673_s27 = scalar_lea.vmem [#allocation3], %s667_s0  ;;  %v765_v41 = vld [vmem:[%s1507_s10] sm:$0xff] (!%p1059_p8)  ;;  %v766_v42 = vld [vmem:[%s1507_s10 + $0x8] sm:$0xff] (!%p1059_p8)  ;;  %v791_v3 = vlaneseq (!%p1059_p8) }
  0x40   : > { %s1534_s0 = scalar_lea.vmem %s1506_s9, %s1551_s1  ;;  %v767_v43 = vld [vmem:[%s1507_s10 + $0x10] sm:$0xff] (!%p1059_p8)  ;;  %v1209_v44 = vmov (!%p1059_p8), 0.0|0.0   ;;  %v1099_v45 = vpack.c.bf16 (!%p1059_p8), %v766_v42, %v765_v41  ;;  %v768_v46 = vld [vmem:[%s1507_s10 + $0x18] sm:$0xff] (!%p1059_p8)  ;;  %vm1210_vm2 = vmmov (!%p1059_p8), 0   ;;  %v1211_v47 = vmov (!%p1059_p8), 0.0  }
  0x41   : > { %v714_v36 = vld [vmem:[%s1534_s0] sm:$0x1]  ;;  %1098 = vmatprep.subr.bf16.mxu0 (!%p1059_p8), %v1209_v44  ;;  %1095 = vmatprep.mubr.msk.f32.mxu0 (!%p1059_p8), %vm1210_vm2, %v1211_v47  ;;  %v1102_v48 = vpack.c.bf16 (!%p1059_p8), %v768_v46, %v767_v43  ;;  %v1212_v1 = vmov (!%p1059_p8), 1966171168   ;;  %vm833_vm3 = vcmask (!%p1059_p8), 261120  }
  0x42   : > { %1100 = vmatpush3.bf16.msra.mxu0 (!%p1059_p8), %v1099_v45  ;;  %v789_v2 = vunpack.c.l.s4 (!%p1059_p8), %v1212_v1 }
  0x43   : > { %1101 = vmatprep.subr.bf16.mxu0 (!%p1059_p8), %v1209_v44  ;;  %v1060_v44 = vld [vmem:[%s1508_s11] ss:$0 sm:$0xff] (!%p1059_p8) }
  0x44   : > { %v790_v5 = vunpack.c.0.s8 (!%p1059_p8), %v789_v2 }
  0x45   : > { %v647_v7 = vld [vmem:[%s646_s29] sm:$0x1] }
  0x46   : > { %v652_v8 = vld [vmem:[%s651_s21] sm:$0x1]  ;;  %v649_v9 = vadd.f32 %v648_v6, %v647_v7  ;;  %1103 = vmatpush3.bf16.msra.mxu0 (!%p1059_p8), %v1102_v48  ;;  %v792_v6 = vshrl.u32 (!%p1059_p8), %v791_v3, 7 }
  0x47   : > { %v653_v10 = vadd.f32 1.0, %v652_v8 }
  0x48   : > { %650 = vst.msk [vmem:[%s646_s29] sm:$0x1] %vm638_vm1, %v649_v9  ;;  %s1526_s29 = scalar_lea.vmem %s1502_s5, %s1543_s20  ;;  %s1529_s20 = sadd.s32 5, %s1296_s13 }
  0x49   : > { %654 = vst.msk [vmem:[%s651_s21] sm:$0x1] %vm638_vm1, %v653_v10  ;;  %v670_v16 = vld [vmem:[%s1526_s29] sm:$0x1]  ;;  %s678_s21 = sld [smem:[#allocation6 + %s1527_s18]]  ;;  %s1530_s29 = scalar_lea.vmem %s1504_s7, %s1547_s24 }
  0x4a   : > { %v692_v26 = vld [vmem:[%s1530_s29] sm:$0x1]  ;;  %s700_s18 = sld [smem:[#allocation6 + %s1531_s22]]  ;;  %s1533_s24 = sadd.s32 7, %s1296_s13 }
  0x4b   : > { %s711_s16 = sld [smem:[#allocation6 + %s1533_s24]] }
  0x4f   : > { %v658_v12 = vld [vmem:[%s657_s17] sm:$0x1]  ;;  %s684_s23 = scalar_lea.vmem [#allocation3], %s678_s21 }
  0x50   : > { %v663_v13 = vld [vmem:[%s662_s14] sm:$0x1]  ;;  %v660_v14 = vadd.f32 %v659_v11, %v658_v12 }
  0x51   : > { %v664_v15 = vadd.f32 1.0, %v663_v13  ;;  %s712_s25 = scalar_lea.vmem [#allocation2], %s711_s16  ;;  %s717_s26 = scalar_lea.vmem [#allocation3], %s711_s16 }
  0x52   : > { %661 = vst.msk [vmem:[%s657_s17] sm:$0x1] %vm638_vm1, %v660_v14  ;;  %s689_s17 = sld [smem:[#allocation6 + %s1529_s20]]  ;;  %s701_s20 = scalar_lea.vmem [#allocation2], %s700_s18 }
  0x53   : > { %665 = vst.msk [vmem:[%s662_s14] sm:$0x1] %vm638_vm1, %v664_v15  ;;  %s679_s14 = scalar_lea.vmem [#allocation2], %s678_s21 }
  0x59   : > { %v669_v17 = vld [vmem:[%s668_s19] sm:$0x1] }
  0x5a   : > { %v674_v18 = vld [vmem:[%s673_s27] sm:$0x1]  ;;  %v671_v19 = vadd.f32 %v670_v16, %v669_v17  ;;  %v793_v16 = vsub.s32 (!%p1059_p8), %v790_v5, %v792_v6 }
  0x5b   : > { %v675_v20 = vadd.f32 1.0, %v674_v18 }
  0x5c   : > { %672 = vst.msk [vmem:[%s668_s19] sm:$0x1] %vm638_vm1, %v671_v19  ;;  %s690_s19 = scalar_lea.vmem [#allocation2], %s689_s17 }
  0x5d   : > { %676 = vst.msk [vmem:[%s673_s27] sm:$0x1] %vm638_vm1, %v675_v20  ;;  %s695_s27 = scalar_lea.vmem [#allocation3], %s689_s17 }
  0x63   : > { %v680_v22 = vld [vmem:[%s679_s14] sm:$0x1] }
  0x64   : > { %v685_v23 = vld [vmem:[%s684_s23] sm:$0x1]  ;;  %v682_v24 = vadd.f32 %v681_v21, %v680_v22 }
  0x65   : > { %v686_v25 = vadd.f32 1.0, %v685_v23 }
  0x66   : > { %683 = vst.msk [vmem:[%s679_s14] sm:$0x1] %vm638_vm1, %v682_v24  ;;  %s706_s14 = scalar_lea.vmem [#allocation3], %s700_s18 }
  0x67   : > { %687 = vst.msk [vmem:[%s684_s23] sm:$0x1] %vm638_vm1, %v686_v25 }
  0x6d   : > { %v691_v27 = vld [vmem:[%s690_s19] sm:$0x1] }
  0x6e   : > { %v696_v28 = vld [vmem:[%s695_s27] sm:$0x1]  ;;  %v693_v29 = vadd.f32 %v692_v26, %v691_v27 }
  0x6f   : > { %v697_v30 = vadd.f32 1.0, %v696_v28 }
  0x70   : > { %694 = vst.msk [vmem:[%s690_s19] sm:$0x1] %vm638_vm1, %v693_v29 }
  0x71   : > { %698 = vst.msk [vmem:[%s695_s27] sm:$0x1] %vm638_vm1, %v697_v30 }
  0x77   : > { %v702_v32 = vld [vmem:[%s701_s20] sm:$0x1] }
  0x78   : > { %v707_v33 = vld [vmem:[%s706_s14] sm:$0x1]  ;;  %v704_v34 = vadd.f32 %v703_v31, %v702_v32 }
  0x79   : > { %v708_v35 = vadd.f32 1.0, %v707_v33 }
  0x7a   : > { %705 = vst.msk [vmem:[%s701_s20] sm:$0x1] %vm638_vm1, %v704_v34 }
  0x7b   : > { %709 = vst.msk [vmem:[%s706_s14] sm:$0x1] %vm638_vm1, %v708_v35 }
  0x7f   : > { %724 = sbr.rel (%p1059_p8) target bundleno = 389 (0x185), region = 68 }
  0x81   : > { %v713_v37 = vld [vmem:[%s712_s25] sm:$0x1] }
  0x82   : > { %v718_v38 = vld [vmem:[%s717_s26] sm:$0x1]  ;;  %v715_v39 = vadd.f32 %v714_v36, %v713_v37 }
  0x83   : > { %v719_v40 = vadd.f32 1.0, %v718_v38 }
  0x84   : > { %716 = vst.msk [vmem:[%s712_s25] sm:$0x1] %vm638_vm1, %v715_v39 }
  0x85   : > { %720 = vst.msk [vmem:[%s717_s26] sm:$0x1] %vm638_vm1, %v719_v40 }
  0x8b   : > { %v725_v4 = vld [vmem:[#allocation2] sm:$0x1]  ;;  %v726_v7 = vld [vmem:[#allocation2 + $0x1] sm:$0x1]  ;;  %v727_v9 = vld [vmem:[#allocation2 + $0x2] sm:$0x1] }
  0x8c   : > { %v733_v49 = vld [vmem:[#allocation3] sm:$0x1]  ;;  %v734_v50 = vld [vmem:[#allocation3 + $0x1] sm:$0x1]  ;;  %v735_v51 = vld [vmem:[#allocation3 + $0x2] sm:$0x1] }
  0x8d   : > { %v736_v52 = vld [vmem:[#allocation3 + $0x3] sm:$0x1]  ;;  %v737_v53 = vld [vmem:[#allocation3 + $0x4] sm:$0x1]  ;;  %v738_v54 = vld [vmem:[#allocation3 + $0x5] sm:$0x1] }
  0x8e   : > { %v741_v55 = vmax.f32 %v733_v49, 1.0  ;;  %v742_v56 = vmax.f32 %v734_v50, 1.0  ;;  %v739_v57 = vld [vmem:[#allocation3 + $0x6] sm:$0x1]  ;;  %v743_v58 = vmax.f32 %v735_v51, 1.0  ;;  %v744_v59 = vmax.f32 %v736_v52, 1.0 }
  0x8f   : > { %v740_v60 = vld [vmem:[#allocation3 + $0x7] sm:$0x1]  ;;  %v745_v61 = vmax.f32 %v737_v53, 1.0  ;;  %v746_v62 = vmax.f32 %v738_v54, 1.0  ;;  %v747_v63 = vmax.f32 %v739_v57, 1.0 }
  0x90   : > { %1126 = vrcp.f32 %v741_v55  ;;  %v748_v0 = vmax.f32 %v740_v60, 1.0  ;;  %v728_v11 = vld [vmem:[#allocation2 + $0x3] sm:$0x1]  ;;  %v729_v14 = vld [vmem:[#allocation2 + $0x4] sm:$0x1] }
  0x91   : > { %1128 = vrcp.f32 %v742_v56  ;;  %v730_v18 = vld [vmem:[#allocation2 + $0x5] sm:$0x1]  ;;  %v731_v21 = vld [vmem:[#allocation2 + $0x6] sm:$0x1]  ;;  %v732_v25 = vld [vmem:[#allocation2 + $0x7] sm:$0x1] }
  0x92   : > { %1130 = vrcp.f32 %v743_v58 }
  0x93   : > { %1132 = vrcp.f32 %v744_v59 }
  0x94   : > { %1134 = vrcp.f32 %v745_v61 }
  0x95   : > { %1136 = vrcp.f32 %v746_v62 }
  0x96   : > { %1138 = vrcp.f32 %v747_v63 }
  0x97   : > { %1140 = vrcp.f32 %v748_v0 }
  0x9a   : > { %v1127_v8 = vpop.eup %1126 }
  0x9b   : > { %v1129_v10 = vpop.eup %1128  ;;  %v750_v12 = vmul.f32 %v1127_v8, %v725_v4 }
  0x9c   : > { %v1131_v13 = vpop.eup %1130  ;;  %v752_v15 = vmul.f32 %v1129_v10, %v726_v7 }
  0x9d   : > { %v1133_v17 = vpop.eup %1132  ;;  %v754_v19 = vmul.f32 %v1131_v13, %v727_v9 }
  0x9e   : > { %v1135_v20 = vpop.eup %1134  ;;  %v756_v22 = vmul.f32 %v1133_v17, %v728_v11  ;;  %v784_v23 = vcombine.low %v750_v12, %v752_v15 }
  0x9f   : > { %v1137_v24 = vpop.eup %1136  ;;  %v758_v26 = vmul.f32 %v1135_v20, %v729_v14 }
  0xa0   : > { %v1139_v27 = vpop.eup %1138  ;;  %v760_v28 = vmul.f32 %v1137_v24, %v730_v18  ;;  %v785_v29 = vcombine.low %v754_v19, %v756_v22  ;;  %v794_v30 = vrot.slane %v784_v23, %v793_v16 }
  0xa1   : > { %v1141_v31 = vpop.eup %1140  ;;  %v762_v32 = vmul.f32 %v1139_v27, %v731_v21 }
  0xa2   : > { %v764_v33 = vmul.f32 %v1141_v31, %v732_v25  ;;  %v786_v34 = vcombine.low %v758_v26, %v760_v28  ;;  %v801_v35 = vrot.slane %v785_v29, %v793_v16 }
  0xa4   : > { %v787_v36 = vcombine.low %v762_v32, %v764_v33  ;;  %v808_v37 = vrot.slane %v786_v34, %v793_v16  ;;  %v816_v38 = vcombine.low %v794_v30, %v801_v35 }
  0xa6   : > { %v815_v39 = vrot.slane %v787_v36, %v793_v16  ;;  %v824_v41 = vrot.slane %v816_v38, %v793_v16 }
  0xa8   : > { %v817_v40 = vcombine.low %v808_v37, %v815_v39 }
  0xaa   : > { %v831_v42 = vrot.slane %v817_v40, %v793_v16 }
  0xac   : > { %v832_v43 = vcombine.low %v824_v41, %v831_v42 }
  0xae   : > { %1096 = vmatmul.mubr.msk.f32.vlgmr.msra.gmra.mrb[0].mxu0 %vm833_vm3, %v832_v43 }
 0x181   : > { %v902_v45 = vpop.f32.mrb[0].mxu0 }
 0x182   : > { %v903_v46 = vadd.f32 %v1060_v44, %v902_v45  ;;  %v1097_v47 = vpop.f32.mrb[1].mxu0 }
 0x184   : > { %906 = vst [vmem:[#allocation7] sm:$0xff] %v903_v46 }
 0x185 PF: > { %p1108_p9 = scmp.eq.s32.totalorder %s1291_s30, 2  ;;  %s1213_s24 = smov [#allocation7]  }
 0x186   : > { %s914_s16 = sshll.u32 %s1213_s24, 4  ;;  %s915_s16 = int_to_ptr.vmem [resolvable:$true] %s914_s16 }
 0x187   : > { %s1166_s20 = scalar_lea.vmem %s915_s16, 128  ;;  %p1173_p13 = scmp.lt.s32.totalorder %s915_s16, %s915_s16 }
 0x188   : > { %p1167_p10 = scmp.ne.s32.totalorder %s915_s16, %s1166_s20  ;;  %p1174_p0 = scmp.lt.s32.totalorder %s1166_s20, %s1166_s20 }
 0x18a   : > { %p1168_p11 = pnand %p1167_p10, %p1108_p9  ;;  %p1175_p1 = por %p1174_p0, %p1173_p13 }
 0x18c   : > { %p1169_p12 = pneg %p1168_p11 }
 0x18e   : > { %p1176_p2 = pnand %p1175_p1, %p1169_p12 }
 0x190   : > { %1179 = shalt.err (!%p1176_p2)
}
 0x191   : > { %s1180_s23 = scalar_lea.hbm %s1509_s12, 128 }
 0x192   : > { %p1181_p3 = scmp.ne.s32.totalorder %s1509_s12, %s1180_s23  ;;  %p1186_p6 = scmp.lt.u32.totalorder %s1180_s23, %s1509_s12 }
 0x194   : > { %p1182_p4 = pnand %p1181_p3, %p1108_p9 }
 0x196   : > { %p1183_p5 = pneg %p1182_p4 }
 0x198   : > { %p1188_p7 = pnand %p1186_p6, %p1183_p5 }
 0x19a   : > { %1191 = shalt.err (!%p1188_p7)
}
 0x19b   : > { %1105 = dma.vmem_to_hbm [thread:$0]  (%p1108_p9), %s915_s16, 128, %s1509_s12, [#allocation8]  }
 0x19c   : > { %1199 = dma.done.wait (%p1108_p9), [#allocation8], 128  }
 0x19d   : > { %1201 = vsyncadd (%p1108_p9), [#allocation8], 4294967168 }
 0x19e PF: > { %s1535_s1 = sld [smem:[#allocation11_spill]] }
 0x1a4   : > { %s33_s1 = sadd.s32 1, %s1535_s1  }
 0x1a5   : > { %p30_p8 = scmp.ge.s32.totalorder %s33_s1, 5  }
 0x1a7   :  { %32 = sbr.rel (!%p30_p8) target bundleno = 26 (0x1a), region = 132 }
 0x1ae   :  { %927 = vsyncpa [#allocation8], 1 }
 0x1af   :  { %929 = vsyncpa [#allocation8 + $0x1], 1 }

</bundles_post_ra>
